<compile_context>
chip_gen: v5e
topology: v5e:2x2
jax: 0.10.0
libtpu: 0.0.40
codegen_flags: <defaults>
</compile_context>

<pallas_src>
import functools

import jax
import jax.numpy as jnp
from jax import lax
from jax.experimental import pallas as pl
from jax.experimental.pallas import tpu as pltpu


def _round_up(n, m):
    return (n + m - 1) // m * m


def compute_tiles(num_nodes, hidden_dim, tv_max=512):
    """Padded sizes + dst-node tile shared by the glue and the kernel wrapper."""
    dp = _round_up(hidden_dim, 128)      # lane-dense hidden dim
    vp = _round_up(num_nodes, 8)         # sublane-aligned node count
    tv = min(vp, tv_max)                 # dst-node rows per grid step
    vp = _round_up(vp, tv)
    return vp, dp, tv


# ----------------------------------------------------------------------------
# Pallas kernel: one (dst-node tile, batch element) pair per grid step.
# ----------------------------------------------------------------------------
def _qk_kernel(x_ref, xt_ref, z_ref, a_ref, vec_ref, w1_ref, w2_ref, out_ref,
               *, valid_d):
    x = x_ref[0]                  # (Vp, Dp) f32 -- all source nodes of this batch
    xt = xt_ref[0]                # (TV, Dp) f32 -- dst-node tile (residual/shortcut)
    z = z_ref[0]                  # (R,  Dp) f32
    num_rel, dp = z.shape
    vp = x.shape[0]

    vecs = vec_ref[...]           # (8, Dp): five packed (1, D) vectors in one DMA
    alpha = vecs[0:1]
    b1 = vecs[1:2]
    b2 = vecs[2:3]
    gamma = vecs[3:4]
    beta = vecs[4:5]

    # --- fused message passing (ONE MXU matmul):
    #     msg[t, d] = sum_{r,h} A'[t, r*Vp + h] * z[r, d] * x[h, d]
    #     Rows of Xz are ordered r*Vp + h, matching A' columns.  bf16 operands
    #     with f32 accumulation (A' holds small integer counts -> exact bf16).
    xz = (z[:, None, :] * x[None, :, :]).reshape(num_rel * vp, dp)
    xz = xz.astype(jnp.bfloat16)
    msg = jnp.dot(a_ref[...], xz, preferred_element_type=jnp.float32)   # (TV, Dp)

    # --- alpha-gated residual into the MLP
    h = msg + alpha * xt

    # --- mlp_out: Linear -> ReLU -> Linear (kept f32; tiny vs. the message matmul)
    h1 = jnp.maximum(
        jnp.dot(h, w1_ref[...], preferred_element_type=jnp.float32) + b1, 0.0)
    h2 = jnp.dot(h1, w2_ref[...], preferred_element_type=jnp.float32) + b2

    # --- LayerNorm over the *valid* hidden dim (PyTorch eps=1e-5, biased var).
    #     Padded lanes of h2 are exactly zero (zero-padded weights/biases), so
    #     the plain sum is correct; only the centered term needs masking.
    dmask = lax.broadcasted_iota(jnp.int32, (1, dp), 1) < valid_d
    inv_d = 1.0 / valid_d
    mean = jnp.sum(h2, axis=-1, keepdims=True) * inv_d
    cent = jnp.where(dmask, h2 - mean, 0.0)
    var = jnp.sum(cent * cent, axis=-1, keepdims=True) * inv_d
    ln = cent * lax.rsqrt(var + 1e-5) * gamma + beta

    # --- outer shortcut (lane-dense store: Dp is a multiple of 128)
    out_ref[0] = (ln + xt).astype(out_ref.dtype)


def knowformer_qk_layer(x, z, a_fused, params, *, tv_max=512):
    """x: (B, V, D) f32, z: (B, R, D) f32,
    a_fused: (Vp, R*Vp) bf16 fused adjacency built by edges_to_adjacency."""
    B, V, D = x.shape
    R = z.shape[1]
    vp, dp, tv = compute_tiles(V, D, tv_max)
    assert a_fused.shape == (vp, R * vp), (a_fused.shape, (vp, R * vp))

    f32 = jnp.float32
    # Zero-pad features / parameters into the lane-dense (Vp, Dp) layout.
    xp = jnp.zeros((B, vp, dp), f32).at[:, :V, :D].set(x.astype(f32))
    zp = jnp.zeros((B, R, dp), f32).at[:, :, :D].set(z.astype(f32))
    w1 = jnp.zeros((dp, dp), f32).at[:D, :D].set(params["w1"].astype(f32))
    w2 = jnp.zeros((dp, dp), f32).at[:D, :D].set(params["w2"].astype(f32))
    # Pack the five tiny (1, D) vectors into one (8, Dp) tile (single small DMA).
    vecs = jnp.zeros((8, dp), f32)
    for row, name in enumerate(("alpha", "b1", "b2", "gamma", "beta")):
        vecs = vecs.at[row, :D].set(params[name].reshape(-1).astype(f32))

    # Grid: dst tile outer, batch inner -> the A' tile is re-fetched only when
    # the dst tile changes; both axes are independent (megacore-parallel).
    grid = (vp // tv, B)

    # Explicit VMEM budget (v7x has 64 MiB/TC; v6e/v5e default scoped limits are
    # 32/16 MiB).  Double-buffered blocks + in-kernel temporaries, capped so we
    # never request more than v7x physical capacity.
    block_bytes = 2 * (vp * dp * 4 + tv * dp * 4 + R * dp * 4
                       + tv * (R * vp) * 2 + 8 * dp * 4 + 2 * dp * dp * 4
                       + tv * dp * 4)
    temp_bytes = R * vp * dp * 6 + 8 * tv * dp * 4
    vmem_limit = int(min(max(block_bytes + temp_bytes, 32 * 2**20), 64 * 2**20))

    flops = 2 * B * vp * (R * vp) * dp + 4 * B * vp * dp * dp
    bytes_accessed = (a_fused.size * 2 + 2 * xp.size * 4 + zp.size * 4
                      + (w1.size + w2.size + vecs.size) * 4 + B * vp * dp * 4)

    out_p = pl.pallas_call(
        functools.partial(_qk_kernel, valid_d=D),
        out_shape=jax.ShapeDtypeStruct((B, vp, dp), f32),
        grid_spec=pltpu.PrefetchScalarGridSpec(
            num_scalar_prefetch=0,
            grid=grid,
            in_specs=[
                pl.BlockSpec((1, vp, dp), lambda v, b: (b, 0, 0)),   # x (all src)
                pl.BlockSpec((1, tv, dp), lambda v, b: (b, v, 0)),   # x dst tile
                pl.BlockSpec((1, R, dp), lambda v, b: (b, 0, 0)),    # z
                pl.BlockSpec((tv, R * vp), lambda v, b: (v, 0)),     # A' tile (bf16)
                pl.BlockSpec((8, dp), lambda v, b: (0, 0)),          # packed vectors
                pl.BlockSpec((dp, dp), lambda v, b: (0, 0)),         # W1
                pl.BlockSpec((dp, dp), lambda v, b: (0, 0)),         # W2
            ],
            out_specs=pl.BlockSpec((1, tv, dp), lambda v, b: (b, v, 0)),
        ),
        compiler_params=pltpu.CompilerParams(
            dimension_semantics=("parallel", "parallel"),
            vmem_limit_bytes=vmem_limit),
        cost_estimate=pl.CostEstimate(flops=int(flops),
                                      transcendentals=int(B * vp),
                                      bytes_accessed=int(bytes_accessed)),
    )(xp, xp, zp, a_fused, vecs, w1, w2)

    return out_p[:, :V, :D]


# ----------------------------------------------------------------------------
# Glue: densify an (E, 3) edge list (h, r, t) into the fused adjacency A'.
# ----------------------------------------------------------------------------
def edges_to_adjacency(edge_index, num_relations, padded_v, graph_mask=None):
    """A'[t, r*padded_v + h] = multiplicity of edge (h, r, t), stored in bf16
    (exact for small integer counts).  This is the layout the kernel contracts
    against (x * z[r]) in a single MXU matmul."""
    if graph_mask is not None:  # mirrors graph.edge_index[graph_mask]
        edge_index = edge_index[graph_mask]
    h, r, t = edge_index[:, 0], edge_index[:, 1], edge_index[:, 2]
    a = jnp.zeros((padded_v, num_relations * padded_v), jnp.float32)
    a = a.at[t, r * padded_v + h].add(1.0)   # edge weight 1.0 (ones_like in ref)
    # TODO(synk): for real KGs (E << R*V^2) replace this densification with a
    # CSR / scalar-prefetch gather formulation (PrefetchScalarGridSpec with
    # per-dst-tile edge offsets) instead of materializing the dense adjacency.
    return a.astype(jnp.bfloat16)


# ----------------------------------------------------------------------------
# Pure-JAX reference (edge-scatter form, all f32) for validation.
# ----------------------------------------------------------------------------
def reference_forward(x, z, edge_index, params):
    h_idx, r_idx, t_idx = edge_index[:, 0], edge_index[:, 1], edge_index[:, 2]
    contrib = z[:, r_idx, :] * x[:, h_idx, :]                 # (B, E, D)
    msg = jnp.zeros_like(x).at[:, t_idx, :].add(contrib)      # scatter over tail
    h = msg + params["alpha"] * x
    h1 = jnp.maximum(h @ params["w1"] + params["b1"], 0.0)
    h2 = h1 @ params["w2"] + params["b2"]
    mean = h2.mean(-1, keepdims=True)
    var = ((h2 - mean) ** 2).mean(-1, keepdims=True)
    ln = (h2 - mean) / jnp.sqrt(var + 1e-5) * params["gamma"] + params["beta"]
    return ln + x


if __name__ == "__main__":
    B, V, R, D, E = 2, 16, 4, 32, 24

    key = jax.random.PRNGKey(0)
    kx, kz, kh, kr, kt, ka, kw1, kb1, kw2, kb2 = jax.random.split(key, 10)

    x = jax.random.normal(kx, (B, V, D), jnp.float32)
    z = jax.random.normal(kz, (B, R, D), jnp.float32)

    # synthetic knowledge-graph edges (head, relation, tail)
    heads = jax.random.randint(kh, (E,), 0, V)
    rels = jax.random.randint(kr, (E,), 0, R)
    tails = jax.random.randint(kt, (E,), 0, V)
    edge_index = jnp.stack([heads, rels, tails], axis=1).astype(jnp.int32)

    # deterministic parameter init (shapes from the module's __init__)
    params = {
        "alpha": jax.random.normal(ka, (1, D), jnp.float32),       # nn.Parameter, normal_
        "w1": 0.1 * jax.random.normal(kw1, (D, D), jnp.float32),   # mlp_out[0]
        "b1": 0.1 * jax.random.normal(kb1, (1, D), jnp.float32),
        "w2": 0.1 * jax.random.normal(kw2, (D, D), jnp.float32),   # mlp_out[2]
        "b2": 0.1 * jax.random.normal(kb2, (1, D), jnp.float32),
        "gamma": jnp.ones((1, D), jnp.float32),                    # LayerNorm weight
        "beta": jnp.zeros((1, D), jnp.float32),                    # LayerNorm bias
    }
    # TODO(synk): self.eps is an nn.Parameter that the reference forward never
    # uses, so it is intentionally omitted here.

    Vp, Dp, TV = compute_tiles(V, D)
    a_fused = edges_to_adjacency(edge_index, R, Vp, graph_mask=None)

    out = knowformer_qk_layer(x, z, a_fused, params)
    out = jax.block_until_ready(out)

    ref = jax.block_until_ready(reference_forward(x, z, edge_index, params))
    assert out.shape == (B, V, D) and out.dtype == jnp.float32
    # bf16 Xz operands in the fused message matmul add ~2^-9 relative rounding
    # (adjacency counts are exact in bf16, accumulation is f32), so the check
    # is slightly looser than the pure-f32 version.
    assert jnp.allclose(out, ref, rtol=1e-2, atol=1e-2), "mismatch vs reference"

    print("KERNEL_OK")
</pallas_src>

<mosaic_0001>
module attributes {stable_mosaic.version = 11 : i64} {
  func.func @_qk_kernel(%arg0: i32, %arg1: i32, %arg2: memref<1x16x128xf32, #tpu.memory_space<vmem>>, %arg3: memref<1x16x128xf32, #tpu.memory_space<vmem>>, %arg4: memref<1x4x128xf32, #tpu.memory_space<vmem>>, %arg5: memref<16x64xbf16, #tpu.memory_space<vmem>>, %arg6: memref<8x128xf32, #tpu.memory_space<vmem>>, %arg7: memref<128x128xf32, #tpu.memory_space<vmem>>, %arg8: memref<128x128xf32, #tpu.memory_space<vmem>>, %arg9: memref<1x16x128xf32, #tpu.memory_space<vmem>>) attributes {dimension_semantics = [#tpu.dimension_semantics<parallel>, #tpu.dimension_semantics<parallel>], iteration_bounds = array<i64: 1, 2>, scalar_prefetch = 0 : i64, scratch_operands = 0 : i64, tpu.core_type = #tpu.core_type<tc>, window_params = [{transform_indices = @transform_0, window_bounds = array<i64: 1, 16, 128>}, {transform_indices = @transform_1, window_bounds = array<i64: 1, 16, 128>}, {transform_indices = @transform_2, window_bounds = array<i64: 1, 4, 128>}, {transform_indices = @transform_3, window_bounds = array<i64: 16, 64>}, {pipeline_mode = #tpu.pipeline_mode<synchronous>, transform_indices = @transform_4, window_bounds = array<i64: 8, 128>}, {pipeline_mode = #tpu.pipeline_mode<synchronous>, transform_indices = @transform_5, window_bounds = array<i64: 128, 128>}, {pipeline_mode = #tpu.pipeline_mode<synchronous>, transform_indices = @transform_6, window_bounds = array<i64: 128, 128>}, {transform_indices = @transform_7, window_bounds = array<i64: 1, 16, 128>}]} {
    %c0 = arith.constant 0 : index
    %c0_0 = arith.constant 0 : index
    %c0_1 = arith.constant 0 : index
    %0 = vector.load %arg2[%c0, %c0_0, %c0_1] : memref<1x16x128xf32, #tpu.memory_space<vmem>>, vector<1x16x128xf32>
    %1 = vector.shape_cast %0 : vector<1x16x128xf32> to vector<16x128xf32>
    %c0_2 = arith.constant 0 : index
    %c0_3 = arith.constant 0 : index
    %c0_4 = arith.constant 0 : index
    %2 = vector.load %arg3[%c0_2, %c0_3, %c0_4] : memref<1x16x128xf32, #tpu.memory_space<vmem>>, vector<1x16x128xf32>
    %3 = vector.shape_cast %2 : vector<1x16x128xf32> to vector<16x128xf32>
    %c0_5 = arith.constant 0 : index
    %c0_6 = arith.constant 0 : index
    %c0_7 = arith.constant 0 : index
    %4 = vector.load %arg4[%c0_5, %c0_6, %c0_7] : memref<1x4x128xf32, #tpu.memory_space<vmem>>, vector<1x4x128xf32>
    %5 = vector.shape_cast %4 : vector<1x4x128xf32> to vector<4x128xf32>
    %c0_8 = arith.constant 0 : index
    %c0_9 = arith.constant 0 : index
    %6 = vector.load %arg6[%c0_8, %c0_9] : memref<8x128xf32, #tpu.memory_space<vmem>>, vector<8x128xf32>
    %7 = vector.extract_strided_slice %6 {offsets = [0, 0], sizes = [1, 128], strides = [1, 1]} : vector<8x128xf32> to vector<1x128xf32>
    %8 = vector.extract_strided_slice %6 {offsets = [1, 0], sizes = [1, 128], strides = [1, 1]} : vector<8x128xf32> to vector<1x128xf32>
    %9 = vector.extract_strided_slice %6 {offsets = [2, 0], sizes = [1, 128], strides = [1, 1]} : vector<8x128xf32> to vector<1x128xf32>
    %10 = vector.extract_strided_slice %6 {offsets = [3, 0], sizes = [1, 128], strides = [1, 1]} : vector<8x128xf32> to vector<1x128xf32>
    %11 = vector.extract_strided_slice %6 {offsets = [4, 0], sizes = [1, 128], strides = [1, 1]} : vector<8x128xf32> to vector<1x128xf32>
    %12 = vector.shape_cast %5 : vector<4x128xf32> to vector<4x1x128xf32>
    %13 = vector.shape_cast %1 : vector<16x128xf32> to vector<1x16x128xf32>
    %14 = vector.broadcast %12 : vector<4x1x128xf32> to vector<4x16x128xf32>
    %15 = vector.broadcast %13 : vector<1x16x128xf32> to vector<4x16x128xf32>
    %16 = arith.mulf %14, %15 : vector<4x16x128xf32>
    %17 = vector.shape_cast %16 : vector<4x16x128xf32> to vector<64x128xf32>
    %18 = arith.truncf %17 : vector<64x128xf32> to vector<64x128xbf16>
    %c0_10 = arith.constant 0 : index
    %c0_11 = arith.constant 0 : index
    %19 = vector.load %arg5[%c0_10, %c0_11] : memref<16x64xbf16, #tpu.memory_space<vmem>>, vector<16x64xbf16>
    %cst = arith.constant dense<0.000000e+00> : vector<16x128xf32>
    %20 = tpu.matmul %19, %18, %cst {dimension_numbers = #tpu.dot_dimension_numbers<[1], [0], [0], [1], [0, 0, 1, 1], [], []>} : vector<16x64xbf16>, vector<64x128xbf16>, vector<16x128xf32> -> vector<16x128xf32>
    %21 = vector.broadcast %7 : vector<1x128xf32> to vector<16x128xf32>
    %22 = arith.mulf %21, %3 : vector<16x128xf32>
    %23 = arith.addf %20, %22 : vector<16x128xf32>
    %c0_12 = arith.constant 0 : index
    %c0_13 = arith.constant 0 : index
    %24 = vector.load %arg7[%c0_12, %c0_13] : memref<128x128xf32, #tpu.memory_space<vmem>>, vector<128x128xf32>
    %cst_14 = arith.constant dense<0.000000e+00> : vector<16x128xf32>
    %25 = tpu.matmul %23, %24, %cst_14 {dimension_numbers = #tpu.dot_dimension_numbers<[1], [0], [0], [1], [0, 0, 1, 1], [], []>} : vector<16x128xf32>, vector<128x128xf32>, vector<16x128xf32> -> vector<16x128xf32>
    %26 = vector.broadcast %8 : vector<1x128xf32> to vector<16x128xf32>
    %27 = arith.addf %25, %26 : vector<16x128xf32>
    %cst_15 = arith.constant 0.000000e+00 : f32
    %28 = vector.broadcast %cst_15 : f32 to vector<16x128xf32>
    %29 = arith.maximumf %27, %28 : vector<16x128xf32>
    %c0_16 = arith.constant 0 : index
    %c0_17 = arith.constant 0 : index
    %30 = vector.load %arg8[%c0_16, %c0_17] : memref<128x128xf32, #tpu.memory_space<vmem>>, vector<128x128xf32>
    %cst_18 = arith.constant dense<0.000000e+00> : vector<16x128xf32>
    %31 = tpu.matmul %29, %30, %cst_18 {dimension_numbers = #tpu.dot_dimension_numbers<[1], [0], [0], [1], [0, 0, 1, 1], [], []>} : vector<16x128xf32>, vector<128x128xf32>, vector<16x128xf32> -> vector<16x128xf32>
    %32 = vector.broadcast %9 : vector<1x128xf32> to vector<16x128xf32>
    %33 = arith.addf %31, %32 : vector<16x128xf32>
    %34 = tpu.iota {dimensions = array<i32: 1>} : vector<1x128xi32>
    %c32_i32 = arith.constant 32 : i32
    %35 = vector.broadcast %c32_i32 : i32 to vector<1x128xi32>
    %36 = arith.cmpi slt, %34, %35 : vector<1x128xi32>
    %cst_19 = arith.constant dense<0.000000e+00> : vector<16xf32>
    %37 = vector.multi_reduction <add>, %33, %cst_19 [1] : vector<16x128xf32> to vector<16xf32>
    %38 = vector.shape_cast %37 : vector<16xf32> to vector<16x1xf32>
    %cst_20 = arith.constant 3.125000e-02 : f32
    %39 = vector.broadcast %cst_20 : f32 to vector<16x1xf32>
    %40 = arith.mulf %38, %39 : vector<16x1xf32>
    %41 = vector.broadcast %40 : vector<16x1xf32> to vector<16x128xf32>
    %42 = arith.subf %33, %41 : vector<16x128xf32>
    %cst_21 = arith.constant 0.000000e+00 : f32
    %43 = vector.shape_cast %36 : vector<1x128xi1> to vector<1x128xi1>
    %44 = vector.broadcast %43 : vector<1x128xi1> to vector<16x128xi1>
    %45 = vector.broadcast %cst_21 : f32 to vector<16x128xf32>
    %46 = arith.select %44, %42, %45 : vector<16x128xi1>, vector<16x128xf32>
    %47 = arith.mulf %46, %46 : vector<16x128xf32>
    %cst_22 = arith.constant dense<0.000000e+00> : vector<16xf32>
    %48 = vector.multi_reduction <add>, %47, %cst_22 [1] : vector<16x128xf32> to vector<16xf32>
    %49 = vector.shape_cast %48 : vector<16xf32> to vector<16x1xf32>
    %cst_23 = arith.constant 3.125000e-02 : f32
    %50 = vector.broadcast %cst_23 : f32 to vector<16x1xf32>
    %51 = arith.mulf %49, %50 : vector<16x1xf32>
    %cst_24 = arith.constant 9.99999974E-6 : f32
    %52 = vector.broadcast %cst_24 : f32 to vector<16x1xf32>
    %53 = arith.addf %51, %52 : vector<16x1xf32>
    %54 = math.rsqrt %53 : vector<16x1xf32>
    %55 = vector.broadcast %54 : vector<16x1xf32> to vector<16x128xf32>
    %56 = arith.mulf %46, %55 : vector<16x128xf32>
    %57 = vector.broadcast %10 : vector<1x128xf32> to vector<16x128xf32>
    %58 = arith.mulf %56, %57 : vector<16x128xf32>
    %59 = vector.broadcast %11 : vector<1x128xf32> to vector<16x128xf32>
    %60 = arith.addf %58, %59 : vector<16x128xf32>
    %61 = arith.addf %60, %3 : vector<16x128xf32>
    %c0_25 = arith.constant 0 : index
    %c0_26 = arith.constant 0 : index
    %c0_27 = arith.constant 0 : index
    %62 = vector.load %arg9[%c0_25, %c0_26, %c0_27] : memref<1x16x128xf32, #tpu.memory_space<vmem>>, vector<1x16x128xf32>
    %63 = vector.shape_cast %62 : vector<1x16x128xf32> to vector<16x128xf32>
    %64 = vector.shape_cast %61 : vector<16x128xf32> to vector<1x16x128xf32>
    tpu.vector_store %arg9[%c0_25, %c0_26, %c0_27], %64 {strides = array<i32>} : memref<1x16x128xf32, #tpu.memory_space<vmem>>, vector<1x16x128xf32>,
    return
  }
  func.func @transform_0(%arg0: i32, %arg1: i32) -> (i32, i32, i32) {
    %c0_i32 = arith.constant 0 : i32
    %c0_i32_0 = arith.constant 0 : i32
    %c0_i32_1 = arith.constant 0 : i32
    return %arg1, %c0_i32, %c0_i32_0 : i32, i32, i32
  }
  func.func @transform_1(%arg0: i32, %arg1: i32) -> (i32, i32, i32) {
    %c0_i32 = arith.constant 0 : i32
    %c0_i32_0 = arith.constant 0 : i32
    return %arg1, %arg0, %c0_i32 : i32, i32, i32
  }
  func.func @transform_2(%arg0: i32, %arg1: i32) -> (i32, i32, i32) {
    %c0_i32 = arith.constant 0 : i32
    %c0_i32_0 = arith.constant 0 : i32
    %c0_i32_1 = arith.constant 0 : i32
    return %arg1, %c0_i32, %c0_i32_0 : i32, i32, i32
  }
  func.func @transform_3(%arg0: i32, %arg1: i32) -> (i32, i32) {
    %c0_i32 = arith.constant 0 : i32
    %c0_i32_0 = arith.constant 0 : i32
    return %arg0, %c0_i32 : i32, i32
  }
  func.func @transform_4(%arg0: i32, %arg1: i32) -> (i32, i32) {
    %c0_i32 = arith.constant 0 : i32
    %c0_i32_0 = arith.constant 0 : i32
    %c0_i32_1 = arith.constant 0 : i32
    return %c0_i32, %c0_i32_0 : i32, i32
  }
  func.func @transform_5(%arg0: i32, %arg1: i32) -> (i32, i32) {
    %c0_i32 = arith.constant 0 : i32
    %c0_i32_0 = arith.constant 0 : i32
    %c0_i32_1 = arith.constant 0 : i32
    return %c0_i32, %c0_i32_0 : i32, i32
  }
  func.func @transform_6(%arg0: i32, %arg1: i32) -> (i32, i32) {
    %c0_i32 = arith.constant 0 : i32
    %c0_i32_0 = arith.constant 0 : i32
    %c0_i32_1 = arith.constant 0 : i32
    return %c0_i32, %c0_i32_0 : i32, i32
  }
  func.func @transform_7(%arg0: i32, %arg1: i32) -> (i32, i32, i32) {
    %c0_i32 = arith.constant 0 : i32
    %c0_i32_0 = arith.constant 0 : i32
    return %arg1, %arg0, %c0_i32 : i32, i32, i32
  }
}

</mosaic_0001>

<bundles_post_ra>
// kernel: tpu_custom_call.1
= control target key start
LH: loop header
LB: loop body
LE: loop exit
PB: predicated region body
PF: predicated region fallthrough
CT: control target
= control target key end

     0   :  { %s1627_s0 = inlined_call_operand.hbm [shape: f32[2,16,128], index: 0, kind: input, shape index: {}]   ;;  %s1628_s1 = inlined_call_operand.hbm [shape: f32[2,16,128], index: 1, kind: input, shape index: {}]   ;;  %s1629_s2 = inlined_call_operand.hbm [shape: f32[2,4,128], index: 2, kind: input, shape index: {}]   ;;  %s1630_s3 = inlined_call_operand.hbm [shape: bf16[16,64], index: 3, kind: input, shape index: {}]   ;;  %s1631_s4 = inlined_call_operand.hbm [shape: f32[8,128], index: 4, kind: input, shape index: {}]   ;;  %s1632_s5 = inlined_call_operand.hbm [shape: f32[128,128], index: 5, kind: input, shape index: {}]   ;;  %s1633_s6 = inlined_call_operand.hbm [shape: f32[128,128], index: 6, kind: input, shape index: {}]   ;;  %s1634_s7 = inlined_call_operand.hbm [shape: f32[2,16,128], index: 7, kind: output, shape index: {}]  }
   0x1   :  { %1646 = sst [smem:[#allocation26_spill]] %s1628_s1 }
   0x2   :  { %1647 = sst [smem:[#allocation27_spill]] %s1630_s3 }
   0x3   :  { %1648 = sst [smem:[#allocation28_spill]] %s1632_s5 }
   0x4   :  { %12 = vsyncpa [#allocation3], 0 }
   0x5   :  { %14 = vsyncpa [#allocation3 + $0x1], 0 }
   0x6   :  { %15 = vsyncpa [#allocation6], 0 }
   0x7   :  { %17 = vsyncpa [#allocation6 + $0x1], 0 }
   0x8   :  { %18 = vsyncpa [#allocation9], 0 }
   0x9   :  { %19 = vsyncpa [#allocation12], 0 }
   0xa   :  { %20 = vsyncpa [#allocation4], 0 }
   0xb   :  { %22 = vsyncpa [#allocation4 + $0x1], 0  ;;  %s1390_s24 = smov 0   ;;  %s1392_s25 = smov 0  }
   0xc   :  { %s1394_s26 = smov 0   ;;  %s1396_s27 = smov 0  }
   0xd   :  { %s1398_s28 = smov 0   ;;  %s1400_s29 = smov 0  }
   0xe LB: > { %1649 = sst [smem:[#allocation20_spill]] %s1318_s24  ;;  %s1421_s30 = sadd.s32 4294967295, %s1338_s29   ;;  %s1338_s29 = sphi %s1400_s29, %s28_s29   ;;  %s1334_s28 = sphi %s1398_s28, %s1677_s28   ;;  %s1330_s27 = sphi %s1396_s27, %s1676_s27   ;;  %s1326_s26 = sphi %s1394_s26, %s1672_s26   ;;  %s1322_s25 = sphi %s1392_s25, %s1675_s25   ;;  %s1318_s24 = sphi %s1390_s24, %s1674_s24  }
   0xf   : > { %1650 = sst [smem:[#allocation21_spill]] %s1326_s26  ;;  %s857_s8 = sadd.s32 4294967294, %s1338_s29  }
  0x10   : > { %p60_p0 = scmp.ne.s32.totalorder %s1322_s25, %s1318_s24  ;;  %p61_p1 = scmp.eq.s32.totalorder %s1421_s30, 0 }
  0x11   : > { %p229_p2 = scmp.eq.s32.totalorder %s1421_s30, 1  ;;  %p235_p3 = scmp.eq.s32.totalorder %s857_s8, 1 }
  0x12   : > { %p1430_p4 = por %p61_p1, %p60_p0  ;;  %p858_p5 = scmp.ge.s32.totalorder %s1338_s29, 1 }
  0x13   : > { %p1435_p6 = por %p235_p3, %p60_p0  ;;  %p242_p7 = scmp.lt.s32.totalorder %s1338_s29, 3 }
  0x14   : > { %s1654_s3 = sld [smem:[#allocation27_spill]]  ;;  %s1340_s15 = smov [#allocation8]  }
  0x15   : > { %s1652_s10 = scalar_select %p1435_p6, 1, 0 }
  0x16   : > { %p1443_p8 = pnand %p858_p5, %p242_p7  ;;  %s258_s16 = sshll.u32 %s1340_s15, 4  ;;  %s259_s16 = int_to_ptr.vmem [resolvable:$true] %s258_s16 }
  0x17   : > { %1653 = sst [smem:[#allocation22_spill]] %s1652_s10  ;;  %s1341_s21 = smov 64  }
  0x18   : > { %p935_p9 = pneg %p1443_p8  ;;  %s1657_s5 = sld [smem:[#allocation28_spill]] }
  0x19   : > { %s1342_s22 = smov 4   ;;  %s1343_s23 = smov [#allocation11]  }
  0x1a   : > { %s256_s13 = sshll.u32 %s1654_s3, 4  ;;  %p1451_p10 = pnand %p935_p9, %p61_p1  ;;  %s257_s13 = int_to_ptr.hbm [resolvable:$true] %s256_s13 }
  0x1b   : > { %s284_s8 = sshll.u32 %s1343_s23, 4  ;;  %s1635_s11 = smov 128   ;;  %s285_s8 = int_to_ptr.vmem [resolvable:$true] %s284_s8 }
  0x1c   : > { %938 = dma.hbm_to_vmem [thread:$0]  (!%p1451_p10), %s257_s13, 128, %s259_s16, [#allocation9], %s1341_s21, %s1341_s21, %s1342_s22  }
  0x1d   : > { %s1637_s12 = smov 8   ;;  %s37_s15 = sadd.s32 1, %s1334_s28 }
  0x1e   : > { %s282_s20 = sshll.u32 %s1657_s5, 4  ;;  %s47_s18 = sadd.s32 1, %s1326_s26  ;;  %s283_s20 = int_to_ptr.hbm [resolvable:$true] %s282_s20 }
  0x1f   : > { %944 = dma.hbm_to_vmem [thread:$0]  (!%p1451_p10), %s283_s20, 2048, %s285_s8, [#allocation12], %s1635_s11, %s1635_s11, %s1637_s12  }
  0x20   : > { %p38_p12 = scmp.ge.s32.totalorder %s37_s15, 2  ;;  %p54_p13 = scmp.ne.s32.totalorder %s1326_s26, %s1322_s25 }
  0x21   : > { %p55_p0 = scmp.eq.s32.totalorder %s1338_s29, 0  ;;  %p966_p3 = scmp.lt.s32.totalorder %s1338_s29, 2 }
  0x22   : > { %s1679_s15 = smov (%p38_p12, %s37_s15), 0  ;;  %p1476_p7 = por %p229_p2, %p54_p13 }
  0x23   : > { %1658 = sst [smem:[#allocation23_spill]] %s1679_s15  ;;  %p56_p5 = por %p55_p0, %p54_p13 }
  0x24   : > { %s1659_s13 = scalar_select %p1476_p7, 1, 0 }
  0x25   : > { %s44_s16 = ssub.s32 %s1334_s28, %s1679_s15  ;;  %s1483_s19 = sand.u32 1, %s1326_s26  }
  0x26   : > { %1660 = sst [smem:[#allocation24_spill]] %s1659_s13  ;;  %p45_p9 = scmp.eq.s32.totalorder %s44_s16, 0 }
  0x27   : > { %s1645_s20 = sshll.u32 %s1483_s19, 4  ;;  %s891_s21 = sshll.u32 %s1334_s28, 4 }
  0x28   : > { %p1487_p11 = pnand %p966_p3, %p56_p5  ;;  %s334_s8 = sand.u32 1, %s1338_s29  }
  0x29   : > { %s1492_s23 = scalar_select %p45_p9, %s1326_s26, %s47_s18  }
  0x2a   : > { %s1663_s1 = sld [smem:[#allocation26_spill]]  ;;  %s338_s5 = scalar_lea.vmem [#allocation5], %s1645_s20 }
  0x2b   : > { %1662 = sst [smem:[#allocation25_spill]] %s1492_s23  ;;  %s348_s15 = sshll.u32 %s338_s5, 4  ;;  %s349_s15 = int_to_ptr.vmem [resolvable:$true] %s348_s15 }
  0x2c   : > { %s271_s13 = sshll.u32 %s1631_s4, 4  ;;  %s1503_s18 = scalar_lea.sflag [#allocation6], %s334_s8  ;;  %s272_s13 = int_to_ptr.hbm [resolvable:$true] %s271_s13 }
  0x2d   : > { %s1664_s23 = smov 8   ;;  %s1665_s26 = smov 128  }
  0x2e   : > { %s1346_s11 = smov [#allocation10]   ;;  %s296_s20 = sshll.u32 %s1633_s6, 4  ;;  %s297_s20 = int_to_ptr.hbm [resolvable:$true] %s296_s20 }
  0x2f   : > { %s1347_s24 = smov [#allocation13]   ;;  %s1666_s5 = sshll.u32 %s1483_s19, 4 }
  0x30   : > { %s345_s3 = scalar_lea.hbm %s1663_s1, %s891_s21  ;;  %s298_s8 = sshll.u32 %s1347_s24, 4  ;;  %s299_s8 = int_to_ptr.vmem [resolvable:$true] %s298_s8 }
  0x31   : > { %s346_s10 = sshll.u32 %s345_s3, 4  ;;  %s273_s3 = sshll.u32 %s1346_s11, 4  ;;  %s347_s10 = int_to_ptr.hbm [resolvable:$true] %s346_s10  ;;  %s274_s3 = int_to_ptr.vmem [resolvable:$true] %s273_s3 }
  0x32   : > { %954 = dma.hbm_to_vmem [thread:$0]  (!%p1487_p11), %s347_s10, 256, %s349_s15, %s1503_s18, %s1665_s26, %s1665_s26, %s1664_s23  }
  0x33   : > { %941 = dma.hbm_to_vmem [thread:$0]  (!%p1451_p10), %s272_s13, 128, %s274_s3, [#allocation9]  }
  0x34   : > { %s321_s15 = scalar_lea.hbm %s1627_s0, %s891_s21  ;;  %s316_s12 = scalar_lea.vmem [#allocation2], %s1666_s5 }
  0x35   : > { %947 = dma.hbm_to_vmem [thread:$0]  (!%p1451_p10), %s297_s20, 2048, %s299_s8, [#allocation12], %s1665_s26, %s1665_s26, %s1664_s23  }
  0x36   : > { %s322_s11 = sshll.u32 %s321_s15, 4  ;;  %s324_s1 = sshll.u32 %s316_s12, 4  ;;  %s323_s11 = int_to_ptr.hbm [resolvable:$true] %s322_s11  ;;  %s325_s1 = int_to_ptr.vmem [resolvable:$true] %s324_s1 }
  0x37   : > { %s313_s13 = scalar_lea.sflag [#allocation3], %s1483_s19  ;;  %s870_s21 = sshll.u32 %s1483_s19, 2 }
  0x38   : > { %951 = dma.hbm_to_vmem [thread:$0]  (!%p1487_p11), %s323_s11, 256, %s325_s1, %s313_s13, %s1665_s26, %s1665_s26, %s1664_s23  }
  0x39   : > { %s871_s17 = sshll.u32 %s1334_s28, 2  ;;  %s362_s16 = scalar_lea.vmem [#allocation7], %s870_s21 }
  0x3a   : > { %s366_s20 = scalar_lea.hbm %s1629_s2, %s871_s17  ;;  %s370_s10 = sshll.u32 %s362_s16, 4  ;;  %s371_s10 = int_to_ptr.vmem [resolvable:$true] %s370_s10 }
  0x3b   : > { %s368_s8 = sshll.u32 %s366_s20, 4  ;;  %379 = sbr.rel (%p1443_p8) target bundleno = 776 (0x308), region = 48  ;;  %s369_s8 = int_to_ptr.hbm [resolvable:$true] %s368_s8 }
  0x3c   : > { %957 = dma.hbm_to_vmem [thread:$0]  (!%p1487_p11), %s369_s8, 64, %s371_s10, %s1503_s18  }
  0x3d   : > { %s1543_s15 = sand.u32 (!%p1443_p8), 1, %s1322_s25  }
  0x3e   : > { %s1546_s1 = sshll.u32 (!%p1443_p8), %s1543_s15, 4  ;;  %s382_s26 = scalar_lea.sflag (!%p1443_p8), [#allocation3], %s1543_s15 }
  0x3f   : > { %s385_s19 = scalar_lea.vmem (!%p1443_p8), [#allocation2], %s1546_s1 }
  0x40   : > { %1297 = dma.done.wait (%p1430_p4), %s382_s26, 256  }
  0x41   : > { %1299 = vsyncadd (%p1430_p4), %s382_s26, 4294967040  ;;  %s391_s14 = sand.u32 1, %s1421_s30   ;;  %s395_s23 = scalar_lea.vmem [#allocation5], %s1546_s1 }
  0x42   : > { %s392_s22 = scalar_lea.sflag [#allocation6], %s391_s14 }
  0x43   : > { %1301 = dma.done.wait (%p1430_p4), %s392_s22, 320  }
  0x44   : > { %1303 = vsyncadd (%p1430_p4), %s392_s22, 4294966976  ;;  %s875_s18 = sshll.u32 %s1543_s15, 2 }
  0x45   : > { %s405_s11 = scalar_lea.vmem [#allocation7], %s875_s18 }
  0x46   : > { %1305 = dma.done.wait (%p61_p1), [#allocation9], 256  }
  0x47   : > { %1307 = vsyncadd (%p61_p1), [#allocation9], 4294967040 }
  0x48   : > { %1309 = dma.done.wait (%p61_p1), [#allocation12], 4096  }
  0x49   : > { %1311 = vsyncadd (%p61_p1), [#allocation12], 4294963200  ;;  %v475_v0 = vld [vmem:[%s405_s11] sm:$0xf]  ;;  %v544_v4 = vld [vmem:[#allocation11 + $0x78] sm:$0xff]  ;;  %vm511_vm0 = vcmask 523264  }
  0x4a   : > { %v480_v1 = vrot.slane %v475_v0, 3  ;;  %v479_v2 = vrot.slane %v475_v0, 2  ;;  %v478_v3 = vrot.slane %v475_v0, 1  ;;  %v471_v5 = vld [vmem:[%s385_s19] sm:$0xff]  ;;  %v472_v6 = vld [vmem:[%s385_s19 + $0x8] sm:$0xff]  ;;  %546 = vmatpush.msra.mxu1 %v544_v4  ;;  %895 = vmatpush.msra.mxu3 %v544_v4  ;;  %v481_v22 = vperm.slane %v475_v0, 0 }
  0x4b   : > { %v543_v7 = vld [vmem:[#allocation11 + $0x70] sm:$0xff]  ;;  %v542_v10 = vld [vmem:[#allocation11 + $0x68] sm:$0xff]  ;;  %v541_v16 = vld [vmem:[#allocation11 + $0x60] sm:$0xff]  ;;  %s466_s30 = scalar_lea.vmem [#allocation14], %s1546_s1  ;;  %s894_s9 = sshll.u32 %s1330_s27, 4 }
  0x4c   : > { %v484_v8 = vperm.slane %v480_v1, 0  ;;  %v483_v9 = vperm.slane %v479_v2, 0  ;;  %v482_v11 = vperm.slane %v478_v3, 0  ;;  %547 = vmatpush.msra.mxu1 %v543_v7  ;;  %896 = vmatpush.msra.mxu3 %v543_v7  ;;  %v540_v18 = vld [vmem:[#allocation11 + $0x58] sm:$0xff]  ;;  %v539_v23 = vld [vmem:[#allocation11 + $0x50] sm:$0xff]  ;;  %v538_v24 = vld [vmem:[#allocation11 + $0x48] sm:$0xff]  ;;  %v489_v26 = vmul.f32 %v481_v22, %v471_v5  ;;  %s682_s21 = scalar_lea.hbm %s1634_s7, %s894_s9 }
  0x4d   : > { %v490_v27 = vmul.f32 %v481_v22, %v472_v6  ;;  %v537_v28 = vld [vmem:[#allocation11 + $0x40] sm:$0xff]  ;;  %v536_v29 = vld [vmem:[#allocation11 + $0x38] sm:$0xff]  ;;  %v535_v31 = vld [vmem:[#allocation11 + $0x30] sm:$0xff]  ;;  %s683_s17 = sshll.u32 %s466_s30, 4  ;;  %s685_s3 = sshll.u32 %s682_s21, 4  ;;  %s684_s17 = int_to_ptr.vmem [resolvable:$true] %s683_s17  ;;  %s686_s3 = int_to_ptr.hbm [resolvable:$true] %s685_s3 }
  0x4e   : > { %v495_v12 = vmul.f32 %v484_v8, %v471_v5  ;;  %v496_v13 = vmul.f32 %v484_v8, %v472_v6  ;;  %v493_v14 = vmul.f32 %v483_v9, %v471_v5  ;;  %v494_v15 = vmul.f32 %v483_v9, %v472_v6  ;;  %548 = vmatpush.msra.mxu1 %v542_v10  ;;  %v534_v32 = vld [vmem:[#allocation11 + $0x28] sm:$0xff]  ;;  %v893_v33 = vld [vmem:[#allocation8] sm:$0xff]  ;;  %v533_v34 = vld [vmem:[#allocation11 + $0x20] sm:$0xff]  ;;  %s669_s27 = scalar_lea.sflag [#allocation4], %s1543_s15  ;;  %s1258_s24 = sshra.s32 %s686_s3, 4  ;;  %s1259_s24 = int_to_ptr.hbm [resolvable:$true] %s1258_s24 }
  0x4f   : > { %897 = vmatpush.msra.mxu3 %v542_v10  ;;  %v491_v20 = vmul.f32 %v482_v11, %v471_v5  ;;  %v492_v21 = vmul.f32 %v482_v11, %v472_v6  ;;  %v497_v30 = vpack.c.bf16 %v490_v27, %v489_v26  ;;  %v532_v35 = vld [vmem:[#allocation11 + $0x18] sm:$0xff]  ;;  %v531_v36 = vld [vmem:[#allocation11 + $0x10] sm:$0xff]  ;;  %v530_v37 = vld [vmem:[#allocation11 + $0x8] sm:$0xff]  ;;  %s1260_s20 = scalar_lea.hbm %s1259_s24, 16  ;;  %s1264_s10 = scalar_lea.hbm %s1634_s7, 32 }
  0x50   : > { %v500_v17 = vpack.c.bf16 %v496_v13, %v495_v12  ;;  %549 = vmatpush.msra.mxu1 %v541_v16  ;;  %v499_v19 = vpack.c.bf16 %v494_v15, %v493_v14  ;;  %v529_v38 = vld [vmem:[#allocation11] sm:$0xff]  ;;  %v586_v39 = vld [vmem:[#allocation13 + $0x78] sm:$0xff]  ;;  %v585_v40 = vld [vmem:[#allocation13 + $0x70] sm:$0xff]  ;;  %v611_v13 = vlaneseq  ;;  %p1261_p1 = scmp.ne.s32.totalorder %s1259_s24, %s1260_s20  ;;  %p1265_p8 = scmp.lt.s32.totalorder %s1259_s24, %s1634_s7 }
  0x51   : > { %898 = vmatpush.msra.mxu3 %v541_v16  ;;  %v498_v25 = vpack.c.bf16 %v492_v21, %v491_v20  ;;  %588 = vmatpush.msra.mxu2 %v586_v39  ;;  %v584_v41 = vld [vmem:[#allocation13 + $0x68] sm:$0xff]  ;;  %v583_v42 = vld [vmem:[#allocation13 + $0x60] sm:$0xff]  ;;  %v582_v43 = vld [vmem:[#allocation13 + $0x58] sm:$0xff]  ;;  %p1266_p10 = scmp.lt.s32.totalorder %s1264_s10, %s1260_s20 }
  0x52   : > { %519 = vmatpush.bf16.msra.mxu0 %v500_v17  ;;  %550 = vmatpush.msra.mxu1 %v540_v18  ;;  %v581_v44 = vld [vmem:[#allocation13 + $0x50] sm:$0xff]  ;;  %v580_v45 = vld [vmem:[#allocation13 + $0x48] sm:$0xff]  ;;  %v1569_v46 = vld [vmem:[#allocation10] sm:$0xff]  ;;  %v612_v14 = vand.u32 127, %v611_v13  ;;  %p1262_p2 = pnand %p1261_p1, %p1476_p7 }
  0x53   : > { %899 = vmatpush.msra.mxu3 %v540_v18  ;;  %589 = vmatpush.msra.mxu2 %v585_v40  ;;  %v579_v47 = vld [vmem:[#allocation13 + $0x40] sm:$0xff]  ;;  %v503_v48 = vperm.slane %v1569_v46, 0  ;;  %v578_v49 = vld [vmem:[#allocation13 + $0x38] sm:$0xff]  ;;  %v577_v51 = vld [vmem:[#allocation13 + $0x30] sm:$0xff]  ;;  %v545_v1 = vperm.slane %v1569_v46, 1  ;;  %v587_v8 = vperm.slane %v1569_v46, 2  ;;  %p1267_p11 = por %p1266_p10, %p1265_p8 }
  0x54   : > { %551 = vmatpush.msra.mxu1 %v539_v23  ;;  %v1574_v50 = vld [vmem:[%s395_s23] sm:$0xff]  ;;  %v575_v54 = vld [vmem:[#allocation13 + $0x20] sm:$0xff]  ;;  %v573_v62 = vld [vmem:[#allocation13 + $0x10] sm:$0xff]  ;;  %vm613_vm1 = vcmp.lt.s32.totalorder %v612_v14, 32  ;;  %v661_v39 = vperm.slane %v1569_v46, 4  ;;  %p1263_p4 = pneg %p1262_p2 }
  0x55   : > { %900 = vmatpush.msra.mxu3 %v539_v23  ;;  %590 = vmatpush.msra.mxu2 %v584_v41  ;;  %v504_v52 = vmul.f32 %v503_v48, %v1574_v50  ;;  %v576_v53 = vld [vmem:[#allocation13 + $0x28] sm:$0xff]  ;;  %v574_v57 = vld [vmem:[#allocation13 + $0x18] sm:$0xff]  ;;  %v1579_v58 = vld [vmem:[%s395_s23 + $0x8] sm:$0xff] }
  0x56   : > { %520 = vmatpush.bf16.msra.mxu0 %v499_v19  ;;  %552 = vmatpush.msra.mxu1 %v538_v24  ;;  %v505_v59 = vmul.f32 %v503_v48, %v1579_v58  ;;  %v572_v63 = vld [vmem:[#allocation13 + $0x8] sm:$0xff]  ;;  %v571_v0 = vld [vmem:[#allocation13] sm:$0xff]  ;;  %p1268_p12 = pnand %p1267_p11, %p1263_p4 }
  0x57   : > { %901 = vmatpush.msra.mxu3 %v538_v24  ;;  %591 = vmatpush.msra.mxu2 %v583_v42 }
  0x58   : > { %553 = vmatpush.msra.mxu1 %v537_v28 }
  0x59   : > { %902 = vmatpush.msra.mxu3 %v537_v28  ;;  %592 = vmatpush.msra.mxu2 %v582_v43 }
  0x5a   : > { %521 = vmatpush.bf16.msra.mxu0 %v498_v25  ;;  %554 = vmatpush.msra.mxu1 %v536_v29 }
  0x5b   : > { %903 = vmatpush.msra.mxu3 %v536_v29  ;;  %593 = vmatpush.msra.mxu2 %v581_v44 }
  0x5c   : > { %555 = vmatpush.msra.mxu1 %v535_v31 }
  0x5d   : > { %904 = vmatpush.msra.mxu3 %v535_v31  ;;  %594 = vmatpush.msra.mxu2 %v580_v45 }
  0x5e   : > { %522 = vmatpush.bf16.msra.mxu0 %v497_v30  ;;  %556 = vmatpush.msra.mxu1 %v534_v32 }
  0x5f   : > { %905 = vmatpush.msra.mxu3 %v534_v32  ;;  %595 = vmatpush.msra.mxu2 %v579_v47 }
  0x60   : > { %557 = vmatpush.msra.mxu1 %v533_v34 }
  0x61   : > { %885 = vmatmul.msk.bf16.vlgmr.msra.gmra.mxu0 %vm511_vm0, %v893_v33  ;;  %906 = vmatpush.msra.mxu3 %v533_v34 }
  0x62   : > { %558 = vmatpush.msra.mxu1 %v532_v35  ;;  %596 = vmatpush.msra.mxu2 %v578_v49 }
  0x63   : > { %907 = vmatpush.msra.mxu3 %v532_v35 }
  0x64   : > { %559 = vmatpush.msra.mxu1 %v531_v36  ;;  %597 = vmatpush.msra.mxu2 %v577_v51 }
  0x65   : > { %908 = vmatpush.msra.mxu3 %v531_v36 }
  0x66   : > { %560 = vmatpush.msra.mxu1 %v530_v37  ;;  %598 = vmatpush.msra.mxu2 %v576_v53 }
  0x67   : > { %909 = vmatpush.msra.mxu3 %v530_v37  ;;  %v658_v37 = vperm.slane %v1569_v46, 3 }
  0x68   : > { %561 = vmatpush.msra.mxu1 %v529_v38  ;;  %599 = vmatpush.msra.mxu2 %v575_v54 }
  0x69   : > { %910 = vmatpush.msra.mxu3 %v529_v38 }
  0x6a   : > { %600 = vmatpush.msra.mxu2 %v574_v57 }
  0x6c   : > { %601 = vmatpush.msra.mxu2 %v573_v62 }
  0x6e   : > { %602 = vmatpush.msra.mxu2 %v572_v63 }
  0x70   : > { %603 = vmatpush.msra.mxu2 %v571_v0 }
  0xde   : > { %v524_v55 = vpop.f32.mrf.mxu0 }
  0xdf   : > { %v525_v56 = vadd.f32 %v524_v55, %v504_v52 }
  0xe1   : > { %562 = vmatmul.f32.vlgmr.msra.gmra.mxu1 %v525_v56 }
  0xe6   : > { %v526_v60 = vpop.f32.mrf.mxu0 }
  0xe7   : > { %v527_v61 = vadd.f32 %v526_v60, %v505_v59 }
  0xe9   : > { %565 = vmatmul.f32.vlgmr.msra.gmra.mxu3 %v527_v61 }
 0x15e   : > { %v563_v2 = vpop.f32.mrf.mxu1 }
 0x15f   : > { %v564_v3 = vadd.f32 %v563_v2, %v545_v1 }
 0x161   : > { %v569_v4 = vmax.f32 %v564_v3, 0.0 }
 0x163   : > { %604 = vmatmul.f32.vlgmr.msra.gmra.mxu2 %v569_v4 }
 0x16c   : > { %v566_v5 = vpop.f32.mrf.mxu3 }
 0x16d   : > { %v567_v6 = vadd.f32 %v566_v5, %v545_v1 }
 0x16f   : > { %v570_v7 = vmax.f32 %v567_v6, 0.0 }
 0x171   : > { %607 = vmatmul.f32.gmra.mxu2 %v570_v7 }
 0x1e6   : > { %v605_v9 = vpop.f32.mrf.mxu2 }
 0x1e7   : > { %v606_v10 = vadd.f32 %v605_v9, %v587_v8 }
 0x1e9   : > { %614 = vadd.xlane.f32.xlu0 %v606_v10 }
 0x1f4   : > { %v608_v11 = vpop.f32.mrf.mxu2 }
 0x1f5   : > { %v609_v12 = vadd.f32 %v608_v11, %v587_v8 }
 0x1f7   : > { %616 = vadd.xlane.f32.xlu0 %v609_v12 }
 0x25c   : > { %v615_v15 = vpop.xlane.xlu0 %614 }
 0x25d   : > { %v618_v16 = vmul.f32 0.03125, %v615_v15 }
 0x25f   : > { %v620_v17 = vsub.f32 %v606_v10, %v618_v16 }
 0x261   : > { %v624_v18 = vsel %vm613_vm1, %v620_v17, 0.0 }
 0x262   : > { %v626_v19 = vmul.f32 %v624_v18, %v624_v18 }
 0x264   : > { %628 = vadd.xlane.f32.xlu1 %v626_v19 }
 0x26a   : > { %v617_v20 = vpop.xlane.xlu0 %616 }
 0x26b   : > { %v619_v21 = vmul.f32 0.03125, %v617_v20 }
 0x26d   : > { %v621_v22 = vsub.f32 %v609_v12, %v619_v21 }
 0x26f   : > { %v625_v23 = vsel %vm613_vm1, %v621_v22, 0.0 }
 0x270   : > { %v627_v24 = vmul.f32 %v625_v23, %v625_v23 }
 0x272   : > { %630 = vadd.xlane.f32.xlu1 %v627_v24 }
 0x2d7   : > { %v629_v25 = vpop.xlane.xlu1 %628 }
 0x2d8   : > { %v632_v26 = vmul.f32 0.03125, %v629_v25 }
 0x2da   : > { %v634_v27 = vadd.f32 1e-05, %v632_v26 }
 0x2dc   : > { %1030 = vrsqrt.f32 %v634_v27  ;;  %vm642_vm3 = vweird.f32 %v634_v27 }
 0x2e2   : > { %v1031_v28 = vpop.eup %1030 }
 0x2e3   : > { %v637_v29 = vmul.f32 %v1031_v28, %v634_v27  ;;  %vm643_vm2 = vweird.f32 %v1031_v28 }
 0x2e4   : > { %vm644_vm4 = vmor %vm642_vm3, %vm643_vm2 }
 0x2e5   : > { %v638_v30 = vmul.f32 %v1031_v28, %v637_v29  ;;  %v631_v31 = vpop.xlane.xlu1 %630 }
 0x2e6   : > { %v633_v32 = vmul.f32 0.03125, %v631_v31 }
 0x2e7   : > { %v639_v33 = vmul.f32 0.5, %v638_v30 }
 0x2e8   : > { %v635_v34 = vadd.f32 1e-05, %v633_v32 }
 0x2e9   : > { %v640_v35 = vsub.f32 1.5, %v639_v33 }
 0x2ea   : > { %1032 = vrsqrt.f32 %v635_v34  ;;  %vm652_vm6 = vweird.f32 %v635_v34 }
 0x2eb   : > { %v641_v36 = vmul.f32 %v1031_v28, %v640_v35 }
 0x2ed   : > { %v645_v38 = vsel %vm644_vm4, %v1031_v28, %v641_v36 }
 0x2ee   : > { %v656_v40 = vmul.f32 %v645_v38, %v624_v18 }
 0x2f0   : > { %v1033_v41 = vpop.eup %1032  ;;  %v659_v42 = vmul.f32 %v658_v37, %v656_v40 }
 0x2f1   : > { %v647_v43 = vmul.f32 %v1033_v41, %v635_v34  ;;  %vm653_vm5 = vweird.f32 %v1033_v41 }
 0x2f2   : > { %v662_v44 = vadd.f32 %v661_v39, %v659_v42  ;;  %vm654_vm7 = vmor %vm652_vm6, %vm653_vm5 }
 0x2f3   : > { %v648_v45 = vmul.f32 %v1033_v41, %v647_v43 }
 0x2f4   : > { %v664_v47 = vadd.f32 %v662_v44, %v1574_v50 }
 0x2f5   : > { %v649_v48 = vmul.f32 0.5, %v648_v45 }
 0x2f6   : > { %666 = vst [vmem:[%s466_s30] sm:$0xff] %v664_v47 }
 0x2f7   : > { %v650_v49 = vsub.f32 1.5, %v649_v48 }
 0x2f9   : > { %v651_v51 = vmul.f32 %v1033_v41, %v650_v49 }
 0x2fb   : > { %v655_v52 = vsel %vm654_vm7, %v1033_v41, %v651_v51 }
 0x2fc   : > { %v657_v46 = vmul.f32 %v655_v52, %v625_v23 }
 0x2fe   : > { %v660_v53 = vmul.f32 %v658_v37, %v657_v46 }
 0x300   : > { %v663_v50 = vadd.f32 %v661_v39, %v660_v53 }
 0x302   : > { %v665_v54 = vadd.f32 %v663_v50, %v1579_v58 }
 0x304   : > { %667 = vst [vmem:[%s466_s30 + $0x8] sm:$0xff] %v665_v54 }
 0x305   : > { %1271 = shalt.err (!%p1268_p12)
}
 0x306   : > { %s1348_s15 = smov 128   ;;  %s1349_s19 = smov 8  }
 0x307   : > { %933 = dma.vmem_to_hbm [thread:$0]  (%p1476_p7), %s684_s17, 256, %s686_s3, %s669_s27, %s1348_s15, %s1348_s15, %s1349_s19  }
 0x308 PF: > { %s1668_s14 = sld [smem:[#allocation20_spill]]  ;;  %p1670_p13 = scmp.ge.s32.totalorder %s1338_s29, 2 }
 0x30a   : > { %p959_p0 = pnand %p1670_p13, %p1435_p6 }
 0x30c   : > { %p960_p3 = pneg %p959_p0 }
 0x30e   : > { %s700_s23 = sand.u32 1, %s1668_s14  }
 0x30f   : > { %s701_s18 = scalar_lea.sflag [#allocation4], %s700_s23 }
 0x310   : > { %1313 = dma.done.wait (%p960_p3), %s701_s18, 256  }
 0x311   : > { %1315 = vsyncadd (%p960_p3), %s701_s18, 4294967040  ;;  %s28_s29 = sadd.s32 1, %s1338_s29   ;;  %s1671_s11 = sld [smem:[#allocation21_spill]] }
 0x312   : > { %p25_p5 = scmp.ge.s32.totalorder %s28_s29, 4   ;;  %s1672_s26 = sld [smem:[#allocation25_spill]] }
 0x313   : > { %s1673_s30 = sld [smem:[#allocation23_spill]]  ;;  %s1674_s24 = smov %s1322_s25 }
 0x314   : > { %s1676_s27 = smov %s1334_s28 }
 0x315   :  { %27 = sbr.rel (!%p25_p5) target bundleno = 14 (0xe), region = 134 }
 0x317   : > { %s1675_s25 = smov %s1671_s11 }
 0x319   : > { %s1677_s28 = smov %s1673_s30 }
 0x31a   :  { %707 = vsyncpa [#allocation3], 1 }
 0x31b   :  { %709 = vsyncpa [#allocation3 + $0x1], 1 }
 0x31c   :  { %710 = vsyncpa [#allocation6], 1 }
 0x31d   :  { %712 = vsyncpa [#allocation6 + $0x1], 1 }
 0x31e   :  { %713 = vsyncpa [#allocation9], 1 }
 0x31f   :  { %714 = vsyncpa [#allocation12], 1 }
 0x320   :  { %715 = vsyncpa [#allocation4], 1 }
 0x321   :  { %717 = vsyncpa [#allocation4 + $0x1], 1 }

</bundles_post_ra>
